<compile_context>
chip_gen: v5e
topology: v5e:2x2
jax: 0.10.0
libtpu: 0.0.40
codegen_flags: <defaults>
</compile_context>

<pallas_src>
import functools

import jax
import jax.numpy as jnp
from jax.experimental import pallas as pl
from jax.experimental.pallas import tpu as pltpu

IN_DIM = 1024
HID_DIM = 256
OUT_DIM = 1
NEG_SLOPE = 0.05
BN_EPS = 1e-5

# Default batch tile: 512 rows -> 2 MiB of f32 x per buffer (4 MiB double
# buffered) + 0.5 MiB bf16 w1; comfortably within every chip's default scoped
# VMEM (incl. v7x's 32 MiB / 64 MiB physical).  v6e/v5e could go larger.
DEFAULT_TILE_B = 512


def _leaky_relu(x, slope):
    return jnp.where(x >= 0, x, slope * x)


def scores_kernel(x_ref, w1_ref, b1_ref, w2_ref, b2_ref, o_ref):
    # x: [TILE_B, 1024] f32.  Elementwise math stays f32 (v5e has no bf16 VPU).
    x = _leaky_relu(x_ref[...], NEG_SLOPE)

    # Linear(1024 -> 256) with BatchNorm folded into the (bf16) weights.
    # bf16 operands, f32 accumulation on the MXU.
    h = jnp.dot(x.astype(jnp.bfloat16), w1_ref[...],
                preferred_element_type=jnp.float32)         # [TILE_B, 256]
    h = h + b1_ref[...]                                     # folded BN bias

    h = _leaky_relu(h, NEG_SLOPE)

    # TODO(synk): Dropout(p) is identity in eval mode; train-mode stochastic
    # masking (pltpu.prng_random_bits) and train-mode BatchNorm batch stats are
    # intentionally not implemented.

    # Linear(256 -> 1) as VPU multiply + lane reduction (avoids an N=1 MXU dot
    # that would waste the systolic array).
    o = jnp.sum(h * w2_ref[...], axis=-1, keepdims=True)    # [TILE_B, 1]
    o_ref[...] = o + b2_ref[...]


@functools.partial(jax.jit, static_argnames=("tile_b",))
def scores_forward(x, params, *, tile_b=DEFAULT_TILE_B):
    """x: [B, 1024] float32 -> [B, 1] float32 (eval-mode Scores forward)."""
    B = x.shape[0]
    w1, b1, gamma, beta, run_mean, run_var, w2, b2 = params

    # Fold BatchNorm (eval) into the first linear layer:
    #   y = (x@w1 + b1 - mean) * scale + beta,  scale = gamma / sqrt(var+eps)
    #   => w1' = w1 * scale,  b1' = (b1 - mean) * scale + beta
    scale = gamma / jnp.sqrt(run_var + BN_EPS)               # [256]
    w1_folded = (w1 * scale[None, :]).astype(jnp.bfloat16)   # [1024, 256] bf16
    b1_folded = ((b1 - run_mean) * scale + beta).reshape(1, HID_DIM)

    w2_row = w2.reshape(1, HID_DIM).astype(jnp.float32)      # [1, 256]
    b2_2d = b2.reshape(1, OUT_DIM)

    # Batch tiling: tile must be a multiple of 8 (sublane), pad B up to a
    # multiple of the tile; extra rows are discarded after the call.
    eff_tile = max(8, min(tile_b, ((B + 7) // 8) * 8))
    B_pad = ((B + eff_tile - 1) // eff_tile) * eff_tile
    if B_pad != B:
        x = jnp.pad(x, ((0, B_pad - B), (0, 0)))
    n_tiles = pl.cdiv(B_pad, eff_tile)

    out = pl.pallas_call(
        scores_kernel,
        out_shape=jax.ShapeDtypeStruct((B_pad, OUT_DIM), jnp.float32),
        grid=(n_tiles,),
        in_specs=[
            # Activations stream through, one batch tile per grid step.
            pl.BlockSpec((eff_tile, IN_DIM), lambda i: (i, 0)),
            # Weights / biases: same block every step -> resident in VMEM.
            pl.BlockSpec((IN_DIM, HID_DIM), lambda i: (0, 0)),
            pl.BlockSpec((1, HID_DIM), lambda i: (0, 0)),
            pl.BlockSpec((1, HID_DIM), lambda i: (0, 0)),
            pl.BlockSpec((1, OUT_DIM), lambda i: (0, 0)),
        ],
        out_specs=pl.BlockSpec((eff_tile, OUT_DIM), lambda i: (i, 0)),
        compiler_params=pltpu.CompilerParams(
            dimension_semantics=("parallel",)),
    )(x, w1_folded, b1_folded, w2_row, b2_2d)

    return out[:B]


def init_params(key):
    k1, k2, k3, k4, k5, k6, k7, k8 = jax.random.split(key, 8)
    # Linear(1024, 256): stored as [in, out] so the kernel matmul is row-major.
    w1 = jax.random.normal(k1, (IN_DIM, HID_DIM), jnp.float32) * 0.02
    b1 = jax.random.normal(k2, (HID_DIM,), jnp.float32) * 0.01
    # BatchNorm1d(256) parameters + running stats.
    gamma = 1.0 + 0.1 * jax.random.normal(k3, (HID_DIM,), jnp.float32)
    beta = 0.1 * jax.random.normal(k4, (HID_DIM,), jnp.float32)
    run_mean = 0.05 * jax.random.normal(k5, (HID_DIM,), jnp.float32)
    run_var = jnp.abs(1.0 + 0.1 * jax.random.normal(k6, (HID_DIM,),
                                                    jnp.float32))
    # Linear(256, 1)
    w2 = jax.random.normal(k7, (HID_DIM, OUT_DIM), jnp.float32) * 0.05
    b2 = 0.01 * jax.random.normal(k8, (OUT_DIM,), jnp.float32)
    return (w1, b1, gamma, beta, run_mean, run_var, w2, b2)


def scores_reference_f32(x, params):
    """Pure-JAX full-f32 reference (matches PyTorch eval-mode semantics)."""
    w1, b1, gamma, beta, run_mean, run_var, w2, b2 = params
    h = _leaky_relu(x, NEG_SLOPE)
    h = jnp.dot(h, w1, precision=jax.lax.Precision.HIGHEST) + b1
    h = (h - run_mean) / jnp.sqrt(run_var + BN_EPS) * gamma + beta
    h = _leaky_relu(h, NEG_SLOPE)
    return jnp.dot(h, w2, precision=jax.lax.Precision.HIGHEST) + b2


def scores_reference_bf16(x, params):
    """Reference using the same bf16-operand / f32-accumulate first matmul."""
    w1, b1, gamma, beta, run_mean, run_var, w2, b2 = params
    scale = gamma / jnp.sqrt(run_var + BN_EPS)
    w1f = (w1 * scale[None, :]).astype(jnp.bfloat16)
    b1f = (b1 - run_mean) * scale + beta
    h = _leaky_relu(x, NEG_SLOPE)
    h = jnp.dot(h.astype(jnp.bfloat16), w1f,
                preferred_element_type=jnp.float32) + b1f
    h = _leaky_relu(h, NEG_SLOPE)
    return jnp.sum(h * w2.reshape(1, HID_DIM), axis=-1, keepdims=True) + b2


if __name__ == "__main__":
    key = jax.random.PRNGKey(0)
    kx, kp = jax.random.split(key)
    params = init_params(kp)

    # Small, module-consistent shape; B=12 is NOT a multiple of the sublane
    # tile, so it also exercises the pad-and-slice path.
    B = 12
    x = jax.random.normal(kx, (B, IN_DIM), jnp.float32)

    out = scores_forward(x, params)
    out = jax.block_until_ready(out)
    assert out.shape == (B, OUT_DIM)

    # Tight check against a reference using the identical bf16-MXU math.
    ref_bf16 = scores_reference_bf16(x, params)
    err_bf16 = jnp.max(jnp.abs(out - ref_bf16))
    assert jnp.allclose(out, ref_bf16, atol=1e-3, rtol=1e-3), (
        f"bf16-matched max err {err_bf16}")

    # Loose check against the full-f32 PyTorch-equivalent reference
    # (difference is purely the bf16 rounding of the first matmul operands).
    ref_f32 = scores_reference_f32(x, params)
    err_f32 = jnp.max(jnp.abs(out - ref_f32))
    assert jnp.allclose(out, ref_f32, atol=3e-2, rtol=3e-2), (
        f"f32 max err {err_f32}")

    print("KERNEL_OK")
</pallas_src>

<mosaic_0001>
module attributes {stable_mosaic.version = 11 : i64} {
  func.func @scores_kernel(%arg0: i32, %arg1: memref<16x1024xf32, #tpu.memory_space<vmem>>, %arg2: memref<1024x256xbf16, #tpu.memory_space<vmem>>, %arg3: memref<1x256xf32, #tpu.memory_space<vmem>>, %arg4: memref<1x256xf32, #tpu.memory_space<vmem>>, %arg5: memref<1x1xf32, #tpu.memory_space<vmem>>, %arg6: memref<16x1xf32, #tpu.memory_space<vmem>>) attributes {dimension_semantics = [#tpu.dimension_semantics<parallel>], iteration_bounds = array<i64: 1>, scalar_prefetch = 0 : i64, scratch_operands = 0 : i64, tpu.core_type = #tpu.core_type<tc>, window_params = [{transform_indices = @transform_0, window_bounds = array<i64: 16, 1024>}, {pipeline_mode = #tpu.pipeline_mode<synchronous>, transform_indices = @transform_1, window_bounds = array<i64: 1024, 256>}, {pipeline_mode = #tpu.pipeline_mode<synchronous>, transform_indices = @transform_2, window_bounds = array<i64: 1, 256>}, {pipeline_mode = #tpu.pipeline_mode<synchronous>, transform_indices = @transform_3, window_bounds = array<i64: 1, 256>}, {pipeline_mode = #tpu.pipeline_mode<synchronous>, transform_indices = @transform_4, window_bounds = array<i64: 1, 1>}, {transform_indices = @transform_5, window_bounds = array<i64: 16, 1>}]} {
    %c0 = arith.constant 0 : index
    %c0_0 = arith.constant 0 : index
    %0 = vector.load %arg1[%c0, %c0_0] : memref<16x1024xf32, #tpu.memory_space<vmem>>, vector<16x1024xf32>
    %cst = arith.constant 0.000000e+00 : f32
    %1 = vector.broadcast %cst : f32 to vector<16x1024xf32>
    %2 = arith.cmpf oge, %0, %1 : vector<16x1024xf32>
    %cst_1 = arith.constant 5.000000e-02 : f32
    %3 = vector.broadcast %cst_1 : f32 to vector<16x1024xf32>
    %4 = arith.mulf %3, %0 : vector<16x1024xf32>
    %5 = arith.select %2, %0, %4 : vector<16x1024xi1>, vector<16x1024xf32>
    %6 = arith.truncf %5 : vector<16x1024xf32> to vector<16x1024xbf16>
    %c0_2 = arith.constant 0 : index
    %c0_3 = arith.constant 0 : index
    %7 = vector.load %arg2[%c0_2, %c0_3] : memref<1024x256xbf16, #tpu.memory_space<vmem>>, vector<1024x256xbf16>
    %cst_4 = arith.constant dense<0.000000e+00> : vector<16x256xf32>
    %8 = tpu.matmul %6, %7, %cst_4 {dimension_numbers = #tpu.dot_dimension_numbers<[1], [0], [0], [1], [0, 0, 1, 1], [], []>} : vector<16x1024xbf16>, vector<1024x256xbf16>, vector<16x256xf32> -> vector<16x256xf32>
    %c0_5 = arith.constant 0 : index
    %c0_6 = arith.constant 0 : index
    %9 = vector.load %arg3[%c0_5, %c0_6] : memref<1x256xf32, #tpu.memory_space<vmem>>, vector<1x256xf32>
    %10 = vector.broadcast %9 : vector<1x256xf32> to vector<16x256xf32>
    %11 = arith.addf %8, %10 : vector<16x256xf32>
    %cst_7 = arith.constant 0.000000e+00 : f32
    %12 = vector.broadcast %cst_7 : f32 to vector<16x256xf32>
    %13 = arith.cmpf oge, %11, %12 : vector<16x256xf32>
    %cst_8 = arith.constant 5.000000e-02 : f32
    %14 = vector.broadcast %cst_8 : f32 to vector<16x256xf32>
    %15 = arith.mulf %14, %11 : vector<16x256xf32>
    %16 = arith.select %13, %11, %15 : vector<16x256xi1>, vector<16x256xf32>
    %c0_9 = arith.constant 0 : index
    %c0_10 = arith.constant 0 : index
    %17 = vector.load %arg4[%c0_9, %c0_10] : memref<1x256xf32, #tpu.memory_space<vmem>>, vector<1x256xf32>
    %18 = vector.broadcast %17 : vector<1x256xf32> to vector<16x256xf32>
    %19 = arith.mulf %16, %18 : vector<16x256xf32>
    %cst_11 = arith.constant dense<0.000000e+00> : vector<16xf32>
    %20 = vector.multi_reduction <add>, %19, %cst_11 [1] : vector<16x256xf32> to vector<16xf32>
    %21 = vector.shape_cast %20 : vector<16xf32> to vector<16x1xf32>
    %c0_12 = arith.constant 0 : index
    %c0_13 = arith.constant 0 : index
    %22 = vector.load %arg5[%c0_12, %c0_13] : memref<1x1xf32, #tpu.memory_space<vmem>>, vector<1x1xf32>
    %23 = vector.broadcast %22 : vector<1x1xf32> to vector<16x1xf32>
    %24 = arith.addf %21, %23 : vector<16x1xf32>
    %c0_14 = arith.constant 0 : index
    %c0_15 = arith.constant 0 : index
    %25 = vector.load %arg6[%c0_14, %c0_15] : memref<16x1xf32, #tpu.memory_space<vmem>>, vector<16x1xf32>
    tpu.vector_store %arg6[%c0_14, %c0_15], %24 {strides = array<i32>} : memref<16x1xf32, #tpu.memory_space<vmem>>, vector<16x1xf32>,
    return
  }
  func.func @transform_0(%arg0: i32) -> (i32, i32) {
    %c0_i32 = arith.constant 0 : i32
    %c0_i32_0 = arith.constant 0 : i32
    return %arg0, %c0_i32 : i32, i32
  }
  func.func @transform_1(%arg0: i32) -> (i32, i32) {
    %c0_i32 = arith.constant 0 : i32
    %c0_i32_0 = arith.constant 0 : i32
    %c0_i32_1 = arith.constant 0 : i32
    return %c0_i32, %c0_i32_0 : i32, i32
  }
  func.func @transform_2(%arg0: i32) -> (i32, i32) {
    %c0_i32 = arith.constant 0 : i32
    %c0_i32_0 = arith.constant 0 : i32
    %c0_i32_1 = arith.constant 0 : i32
    return %c0_i32, %c0_i32_0 : i32, i32
  }
  func.func @transform_3(%arg0: i32) -> (i32, i32) {
    %c0_i32 = arith.constant 0 : i32
    %c0_i32_0 = arith.constant 0 : i32
    %c0_i32_1 = arith.constant 0 : i32
    return %c0_i32, %c0_i32_0 : i32, i32
  }
  func.func @transform_4(%arg0: i32) -> (i32, i32) {
    %c0_i32 = arith.constant 0 : i32
    %c0_i32_0 = arith.constant 0 : i32
    %c0_i32_1 = arith.constant 0 : i32
    return %c0_i32, %c0_i32_0 : i32, i32
  }
  func.func @transform_5(%arg0: i32) -> (i32, i32) {
    %c0_i32 = arith.constant 0 : i32
    %c0_i32_0 = arith.constant 0 : i32
    return %arg0, %c0_i32 : i32, i32
  }
}

</mosaic_0001>

<bundles_post_ra>
// kernel: scores_forward.1
= control target key start
LH: loop header
LB: loop body
LE: loop exit
PB: predicated region body
PF: predicated region fallthrough
CT: control target
= control target key end

     0   :  { %s2744_s1 = inlined_call_operand.vmem [shape: bf16[1024,256], index: 1, kind: input, shape index: {}]   ;;  %s2745_s0 = inlined_call_operand.vmem [shape: f32[16,1024], index: 0, kind: input, shape index: {}]   ;;  %s2746_s2 = inlined_call_operand.vmem [shape: f32[1,256], index: 2, kind: input, shape index: {}]   ;;  %s2747_s4 = inlined_call_operand.<no memory space> [shape: f32[1,1], index: 4, kind: input, shape index: {}]   ;;  %s2748_s3 = inlined_call_operand.vmem [shape: f32[1,256], index: 3, kind: input, shape index: {}]   ;;  %s2749_s5 = inlined_call_operand.vmem [shape: f32[16,1], index: 5, kind: output, shape index: {}]  }
   0x1   :  { %v1191_v0 = vld [vmem:[%s2744_s1 + $0x70] sm:$0xf]  ;;  %v1660_v1 = vld [vmem:[%s2744_s1 + $0x74] sm:$0xf0]  ;;  %v1183_v11 = vld [vmem:[%s2744_s1 + $0x60] sm:$0xf] }
   0x2   :  { %v1255_v2 = vld [vmem:[%s2744_s1 + $0xf0] sm:$0xf]  ;;  %v1192_v3 = vor.u32 %v1660_v1, %v1191_v0  ;;  %v1676_v4 = vld [vmem:[%s2744_s1 + $0xf4] sm:$0xf0]  ;;  %v1658_v13 = vld [vmem:[%s2744_s1 + $0x64] sm:$0xf0] }
   0x3   :  { %v1319_v5 = vld [vmem:[%s2744_s1 + $0x170] sm:$0xf]  ;;  %v1692_v6 = vld [vmem:[%s2744_s1 + $0x174] sm:$0xf0]  ;;  %v1256_v7 = vor.u32 %v1676_v4, %v1255_v2  ;;  %v1247_v14 = vld [vmem:[%s2744_s1 + $0xe0] sm:$0xf]  ;;  %v1184_v16 = vor.u32 %v1658_v13, %v1183_v11 }
   0x4   :  { %v1320_v8 = vor.u32 %v1692_v6, %v1319_v5  ;;  %v1383_v9 = vld [vmem:[%s2744_s1 + $0x1f0] sm:$0xf]  ;;  %v1708_v10 = vld [vmem:[%s2744_s1 + $0x1f4] sm:$0xf0]  ;;  %868 = vmatpush.bf16.msra.mxu0 %v1192_v3  ;;  %v1674_v15 = vld [vmem:[%s2744_s1 + $0xe4] sm:$0xf0] }
   0x5   :  { %v1384_v12 = vor.u32 %v1708_v10, %v1383_v9  ;;  %882 = vmatpush.bf16.msra.mxu1 %v1256_v7  ;;  %v1248_v17 = vor.u32 %v1674_v15, %v1247_v14  ;;  %v1311_v18 = vld [vmem:[%s2744_s1 + $0x160] sm:$0xf]  ;;  %v1690_v19 = vld [vmem:[%s2744_s1 + $0x164] sm:$0xf0]  ;;  %v1175_v23 = vld [vmem:[%s2744_s1 + $0x50] sm:$0xf] }
   0x6   :  { %896 = vmatpush.bf16.msra.mxu2 %v1320_v8  ;;  %v1375_v20 = vld [vmem:[%s2744_s1 + $0x1e0] sm:$0xf]  ;;  %v1312_v21 = vor.u32 %v1690_v19, %v1311_v18  ;;  %v1706_v22 = vld [vmem:[%s2744_s1 + $0x1e4] sm:$0xf0]  ;;  %v1656_v24 = vld [vmem:[%s2744_s1 + $0x54] sm:$0xf0] }
   0x7   :  { %910 = vmatpush.bf16.msra.mxu3 %v1384_v12  ;;  %v1376_v25 = vor.u32 %v1706_v22, %v1375_v20  ;;  %v1239_v26 = vld [vmem:[%s2744_s1 + $0xd0] sm:$0xf]  ;;  %v1672_v27 = vld [vmem:[%s2744_s1 + $0xd4] sm:$0xf0]  ;;  %v1176_v29 = vor.u32 %v1656_v24, %v1175_v23  ;;  %v1167_v35 = vld [vmem:[%s2744_s1 + $0x40] sm:$0xf] }
   0x8   :  { %v1303_v28 = vld [vmem:[%s2744_s1 + $0x150] sm:$0xf]  ;;  %869 = vmatpush.bf16.msra.mxu0 %v1184_v16  ;;  %v1688_v30 = vld [vmem:[%s2744_s1 + $0x154] sm:$0xf0]  ;;  %v1240_v33 = vor.u32 %v1672_v27, %v1239_v26  ;;  %v1654_v36 = vld [vmem:[%s2744_s1 + $0x44] sm:$0xf0] }
   0x9   :  { %v1367_v31 = vld [vmem:[%s2744_s1 + $0x1d0] sm:$0xf]  ;;  %v1704_v32 = vld [vmem:[%s2744_s1 + $0x1d4] sm:$0xf0]  ;;  %883 = vmatpush.bf16.msra.mxu1 %v1248_v17  ;;  %v1304_v34 = vor.u32 %v1688_v30, %v1303_v28  ;;  %v1231_v37 = vld [vmem:[%s2744_s1 + $0xc0] sm:$0xf]  ;;  %v1168_v44 = vor.u32 %v1654_v36, %v1167_v35 }
   0xa   :  { %897 = vmatpush.bf16.msra.mxu2 %v1312_v21  ;;  %v1368_v38 = vor.u32 %v1704_v32, %v1367_v31  ;;  %v1670_v39 = vld [vmem:[%s2744_s1 + $0xc4] sm:$0xf0]  ;;  %v1295_v40 = vld [vmem:[%s2744_s1 + $0x140] sm:$0xf]  ;;  %v1159_v47 = vld [vmem:[%s2744_s1 + $0x30] sm:$0xf] }
   0xb   :  { %911 = vmatpush.bf16.msra.mxu3 %v1376_v25  ;;  %v1686_v41 = vld [vmem:[%s2744_s1 + $0x144] sm:$0xf0]  ;;  %v1359_v42 = vld [vmem:[%s2744_s1 + $0x1c0] sm:$0xf]  ;;  %v1232_v45 = vor.u32 %v1670_v39, %v1231_v37  ;;  %v1652_v48 = vld [vmem:[%s2744_s1 + $0x34] sm:$0xf0] }
   0xc   :  { %v1702_v43 = vld [vmem:[%s2744_s1 + $0x1c4] sm:$0xf0]  ;;  %870 = vmatpush.bf16.msra.mxu0 %v1176_v29  ;;  %v1296_v46 = vor.u32 %v1686_v41, %v1295_v40  ;;  %v1223_v49 = vld [vmem:[%s2744_s1 + $0xb0] sm:$0xf]  ;;  %v1668_v51 = vld [vmem:[%s2744_s1 + $0xb4] sm:$0xf0]  ;;  %v1160_v56 = vor.u32 %v1652_v48, %v1159_v47 }
   0xd   :  { %884 = vmatpush.bf16.msra.mxu1 %v1240_v33  ;;  %v1360_v50 = vor.u32 %v1702_v43, %v1359_v42  ;;  %v1287_v52 = vld [vmem:[%s2744_s1 + $0x130] sm:$0xf]  ;;  %v1684_v53 = vld [vmem:[%s2744_s1 + $0x134] sm:$0xf0]  ;;  %v1224_v57 = vor.u32 %v1668_v51, %v1223_v49  ;;  %v1151_v59 = vld [vmem:[%s2744_s1 + $0x20] sm:$0xf] }
   0xe   :  { %898 = vmatpush.bf16.msra.mxu2 %v1304_v34  ;;  %v1351_v54 = vld [vmem:[%s2744_s1 + $0x1b0] sm:$0xf]  ;;  %v1700_v55 = vld [vmem:[%s2744_s1 + $0x1b4] sm:$0xf0]  ;;  %v1288_v58 = vor.u32 %v1684_v53, %v1287_v52  ;;  %v1650_v60 = vld [vmem:[%s2744_s1 + $0x24] sm:$0xf0] }
   0xf   :  { %912 = vmatpush.bf16.msra.mxu3 %v1368_v38  ;;  %v1215_v61 = vld [vmem:[%s2744_s1 + $0xa0] sm:$0xf]  ;;  %v1352_v62 = vor.u32 %v1700_v55, %v1351_v54  ;;  %v1666_v63 = vld [vmem:[%s2744_s1 + $0xa4] sm:$0xf0]  ;;  %v1152_v4 = vor.u32 %v1650_v60, %v1151_v59  ;;  %v1143_v7 = vld [vmem:[%s2744_s1 + $0x10] sm:$0xf] }
  0x10   :  { %871 = vmatpush.bf16.msra.mxu0 %v1168_v44  ;;  %v1279_v0 = vld [vmem:[%s2744_s1 + $0x120] sm:$0xf]  ;;  %v1682_v1 = vld [vmem:[%s2744_s1 + $0x124] sm:$0xf0]  ;;  %v1216_v5 = vor.u32 %v1666_v63, %v1215_v61  ;;  %v1648_v8 = vld [vmem:[%s2744_s1 + $0x14] sm:$0xf0] }
  0x11   :  { %885 = vmatpush.bf16.msra.mxu1 %v1232_v45  ;;  %v1343_v2 = vld [vmem:[%s2744_s1 + $0x1a0] sm:$0xf]  ;;  %v1698_v3 = vld [vmem:[%s2744_s1 + $0x1a4] sm:$0xf0]  ;;  %v1280_v6 = vor.u32 %v1682_v1, %v1279_v0  ;;  %v1207_v9 = vld [vmem:[%s2744_s1 + $0x90] sm:$0xf]  ;;  %v1144_v16 = vor.u32 %v1648_v8, %v1143_v7 }
  0x12   :  { %899 = vmatpush.bf16.msra.mxu2 %v1296_v46  ;;  %v1344_v10 = vor.u32 %v1698_v3, %v1343_v2  ;;  %v1664_v11 = vld [vmem:[%s2744_s1 + $0x94] sm:$0xf0]  ;;  %v1271_v12 = vld [vmem:[%s2744_s1 + $0x110] sm:$0xf]  ;;  %v1135_v17 = vld [vmem:[%s2744_s1] sm:$0xf] }
  0x13   :  { %913 = vmatpush.bf16.msra.mxu3 %v1360_v50  ;;  %v1680_v13 = vld [vmem:[%s2744_s1 + $0x114] sm:$0xf0]  ;;  %v1335_v14 = vld [vmem:[%s2744_s1 + $0x190] sm:$0xf]  ;;  %v1646_v18 = vld [vmem:[%s2744_s1 + $0x4] sm:$0xf0]  ;;  %v1208_v19 = vor.u32 %v1664_v11, %v1207_v9 }
  0x14   :  { %872 = vmatpush.bf16.msra.mxu0 %v1160_v56  ;;  %v1696_v15 = vld [vmem:[%s2744_s1 + $0x194] sm:$0xf0]  ;;  %v1272_v20 = vor.u32 %v1680_v13, %v1271_v12  ;;  %v1199_v21 = vld [vmem:[%s2744_s1 + $0x80] sm:$0xf]  ;;  %v1662_v22 = vld [vmem:[%s2744_s1 + $0x84] sm:$0xf0]  ;;  %v1136_v31 = vor.u32 %v1646_v18, %v1135_v17 }
  0x15   :  { %886 = vmatpush.bf16.msra.mxu1 %v1224_v57  ;;  %v1263_v23 = vld [vmem:[%s2744_s1 + $0x100] sm:$0xf]  ;;  %v1336_v24 = vor.u32 %v1696_v15, %v1335_v14  ;;  %v1678_v25 = vld [vmem:[%s2744_s1 + $0x104] sm:$0xf0]  ;;  %v1447_v28 = vld [vmem:[%s2744_s1 + $0x270] sm:$0xf]  ;;  %v1200_v35 = vor.u32 %v1662_v22, %v1199_v21 }
  0x16   :  { %900 = vmatpush.bf16.msra.mxu2 %v1288_v58  ;;  %v1327_v26 = vld [vmem:[%s2744_s1 + $0x180] sm:$0xf]  ;;  %v1694_v27 = vld [vmem:[%s2744_s1 + $0x184] sm:$0xf0]  ;;  %v1724_v29 = vld [vmem:[%s2744_s1 + $0x274] sm:$0xf0]  ;;  %v1264_v36 = vor.u32 %v1678_v25, %v1263_v23 }
  0x17   :  { %914 = vmatpush.bf16.msra.mxu3 %v1352_v62  ;;  %v1511_v30 = vld [vmem:[%s2744_s1 + $0x2f0] sm:$0xf]  ;;  %v1740_v32 = vld [vmem:[%s2744_s1 + $0x2f4] sm:$0xf0]  ;;  %v1439_v39 = vld [vmem:[%s2744_s1 + $0x260] sm:$0xf]  ;;  %v1328_v40 = vor.u32 %v1694_v27, %v1327_v26  ;;  %v1448_v41 = vor.u32 %v1724_v29, %v1447_v28 }
  0x18   :  { %873 = vmatpush.bf16.msra.mxu0 %v1152_v4  ;;  %v1575_v33 = vld [vmem:[%s2744_s1 + $0x370] sm:$0xf]  ;;  %v1756_v34 = vld [vmem:[%s2744_s1 + $0x374] sm:$0xf0]  ;;  %v1722_v42 = vld [vmem:[%s2744_s1 + $0x264] sm:$0xf0]  ;;  %v1512_v45 = vor.u32 %v1740_v32, %v1511_v30 }
  0x19   :  { %887 = vmatpush.bf16.msra.mxu1 %v1216_v5  ;;  %v1639_v37 = vld [vmem:[%s2744_s1 + $0x3f0] sm:$0xf]  ;;  %v1772_v38 = vld [vmem:[%s2744_s1 + $0x3f4] sm:$0xf0]  ;;  %v1503_v43 = vld [vmem:[%s2744_s1 + $0x2e0] sm:$0xf]  ;;  %v1576_v46 = vor.u32 %v1756_v34, %v1575_v33  ;;  %v1440_v52 = vor.u32 %v1722_v42, %v1439_v39 }
  0x1a   :  { %901 = vmatpush.bf16.msra.mxu2 %v1280_v6  ;;  %v1738_v44 = vld [vmem:[%s2744_s1 + $0x2e4] sm:$0xf0]  ;;  %v1567_v47 = vld [vmem:[%s2744_s1 + $0x360] sm:$0xf]  ;;  %v1640_v48 = vor.u32 %v1772_v38, %v1639_v37  ;;  %v2047_v54 = vld [vmem:[%s2744_s1 + $0x250] sm:$0xf] }
  0x1b   :  { %915 = vmatpush.bf16.msra.mxu3 %v1344_v10  ;;  %v1754_v49 = vld [vmem:[%s2744_s1 + $0x364] sm:$0xf0]  ;;  %v1631_v50 = vld [vmem:[%s2744_s1 + $0x3e0] sm:$0xf]  ;;  %v1504_v53 = vor.u32 %v1738_v44, %v1503_v43  ;;  %v2052_v55 = vld [vmem:[%s2744_s1 + $0x254] sm:$0xf0] }
  0x1c   :  { %874 = vmatpush.bf16.msra.mxu0 %v1144_v16  ;;  %v1770_v51 = vld [vmem:[%s2744_s1 + $0x3e4] sm:$0xf0]  ;;  %v2057_v56 = vld [vmem:[%s2744_s1 + $0x2d0] sm:$0xf]  ;;  %v2062_v57 = vld [vmem:[%s2744_s1 + $0x2d4] sm:$0xf0]  ;;  %v1568_v1 = vor.u32 %v1754_v49, %v1567_v47  ;;  %v1432_v16 = vor.u32 %v2052_v55, %v2047_v54 }
  0x1d   :  { %888 = vmatpush.bf16.msra.mxu1 %v1208_v19  ;;  %v22_v58 = vld [vmem:[%s2745_s0] sm:$0xff]  ;;  %v24_v60 = vld [vmem:[%s2745_s0 + $0x10] sm:$0xff]  ;;  %v1752_v62 = vld [vmem:[%s2744_s1 + $0x354] sm:$0xf0]  ;;  %v1632_v2 = vor.u32 %v1770_v51, %v1631_v50  ;;  %v1496_v17 = vor.u32 %v2062_v57, %v2057_v56 }
  0x1e   :  { %902 = vmatpush.bf16.msra.mxu2 %v1272_v20  ;;  %v30_v59 = vld [vmem:[%s2745_s0 + $0x40] sm:$0xff]  ;;  %v1559_v61 = vld [vmem:[%s2744_s1 + $0x350] sm:$0xf]  ;;  %vm38_vm0 = vcmp.ge.f32.partialorder %v22_v58, 0.0  ;;  %v54_v63 = vmul.f32 0.05, %v22_v58 }
  0x1f   :  { %916 = vmatpush.bf16.msra.mxu3 %v1336_v24  ;;  %vm46_vm1 = vcmp.ge.f32.partialorder %v30_v59, 0.0  ;;  %v62_v0 = vmul.f32 0.05, %v30_v59  ;;  %v1623_v3 = vld [vmem:[%s2744_s1 + $0x3d0] sm:$0xf]  ;;  %vm40_vm2 = vcmp.ge.f32.partialorder %v24_v60, 0.0  ;;  %v1560_v22 = vor.u32 %v1752_v62, %v1559_v61 }
  0x20   :  { %875 = vmatpush.bf16.msra.mxu0 %v1136_v31  ;;  %v32_v4 = vld [vmem:[%s2745_s0 + $0x50] sm:$0xff]  ;;  %v56_v5 = vmul.f32 0.05, %v24_v60  ;;  %v1768_v6 = vld [vmem:[%s2744_s1 + $0x3d4] sm:$0xf0]  ;;  %v70_v7 = vsel %vm38_vm0, %v22_v58, %v54_v63  ;;  %v23_v10 = vld [vmem:[%s2745_s0 + $0x8] sm:$0xff] }
  0x21   :  { %889 = vmatpush.bf16.msra.mxu1 %v1200_v35  ;;  %v78_v8 = vsel %vm46_vm1, %v30_v59, %v62_v0  ;;  %vm48_vm3 = vcmp.ge.f32.partialorder %v32_v4, 0.0  ;;  %v64_v9 = vmul.f32 0.05, %v32_v4  ;;  %v1423_v11 = vld [vmem:[%s2744_s1 + $0x240] sm:$0xf]  ;;  %v1624_v23 = vor.u32 %v1768_v6, %v1623_v3  ;;  %v31_v27 = vld [vmem:[%s2745_s0 + $0x48] sm:$0xff] }
  0x22   :  { %903 = vmatpush.bf16.msra.mxu2 %v1264_v36  ;;  %v1718_v12 = vld [vmem:[%s2744_s1 + $0x244] sm:$0xf0]  ;;  %v1487_v13 = vld [vmem:[%s2744_s1 + $0x2c0] sm:$0xf]  ;;  %v2100_v14 = vpack.c.bf16 %v78_v8, %v70_v7  ;;  %v72_v15 = vsel %vm40_vm2, %v24_v60, %v56_v5  ;;  %vm39_vm4 = vcmp.ge.f32.partialorder %v23_v10, 0.0  ;;  %v25_v28 = vld [vmem:[%s2745_s0 + $0x18] sm:$0xff] }
  0x23   :  { %917 = vmatpush.bf16.msra.mxu3 %v1328_v40  ;;  %v1734_v18 = vld [vmem:[%s2744_s1 + $0x2c4] sm:$0xf0]  ;;  %v1551_v19 = vld [vmem:[%s2744_s1 + $0x340] sm:$0xf]  ;;  %v80_v21 = vsel %vm48_vm3, %v32_v4, %v64_v9  ;;  %v33_v29 = vld [vmem:[%s2745_s0 + $0x58] sm:$0xff]  ;;  %vm47_vm5 = vcmp.ge.f32.partialorder %v31_v27, 0.0  ;;  %v1424_v32 = vor.u32 %v1718_v12, %v1423_v11 }
  0x24   :  { %924 = vmatpush.bf16.msrb.mxu0 %v1448_v41  ;;  %v1750_v20 = vld [vmem:[%s2744_s1 + $0x344] sm:$0xf0]  ;;  %v1615_v24 = vld [vmem:[%s2744_s1 + $0x3c0] sm:$0xf]  ;;  %v2121_v26 = vpack.c.bf16 %v80_v21, %v72_v15  ;;  %v55_v30 = vmul.f32 0.05, %v23_v10  ;;  %v1488_v35 = vor.u32 %v1734_v18, %v1487_v13 }
  0x25   :  { %938 = vmatpush.bf16.msrb.mxu1 %v1512_v45  ;;  %v1766_v25 = vld [vmem:[%s2744_s1 + $0x3c4] sm:$0xf0]  ;;  %876 = vmatmul.bf16.vlgmr.msra.gmra.mxu0 %v2100_v14  ;;  %v63_v31 = vmul.f32 0.05, %v31_v27  ;;  %vm41_vm6 = vcmp.ge.f32.partialorder %v25_v28, 0.0  ;;  %vm49_vm7 = vcmp.ge.f32.partialorder %v33_v29, 0.0  ;;  %v1552_v36 = vor.u32 %v1750_v20, %v1551_v19 }
  0x26   :  { %952 = vmatpush.bf16.msrb.mxu2 %v1576_v46  ;;  %v57_v33 = vmul.f32 0.05, %v25_v28  ;;  %v65_v34 = vmul.f32 0.05, %v33_v29  ;;  %v1415_v37 = vld [vmem:[%s2744_s1 + $0x230] sm:$0xf]  ;;  %v71_v38 = vsel %vm39_vm4, %v23_v10, %v55_v30  ;;  %v1616_v46 = vor.u32 %v1766_v25, %v1615_v24 }
  0x27   :  { %966 = vmatpush.bf16.msrb.mxu3 %v1640_v48  ;;  %904 = vmatmul.bf16.vlgmr.msra.gmra.mxu2 %v2121_v26  ;;  %v79_v39 = vsel %vm47_vm5, %v31_v27, %v63_v31  ;;  %v1716_v40 = vld [vmem:[%s2744_s1 + $0x234] sm:$0xf0]  ;;  %v1479_v41 = vld [vmem:[%s2744_s1 + $0x2b0] sm:$0xf]  ;;  %v1471_v55 = vld [vmem:[%s2744_s1 + $0x2a0] sm:$0xf] }
  0x28   :  { %925 = vmatpush.bf16.msrb.mxu0 %v1440_v52  ;;  %v1732_v42 = vld [vmem:[%s2744_s1 + $0x2b4] sm:$0xf0]  ;;  %v2147_v43 = vpack.c.bf16 %v79_v39, %v71_v38  ;;  %v73_v44 = vsel %vm41_vm6, %v25_v28, %v57_v33  ;;  %v81_v45 = vsel %vm49_vm7, %v33_v29, %v65_v34  ;;  %v1543_v47 = vld [vmem:[%s2744_s1 + $0x330] sm:$0xf]  ;;  %v1407_v52 = vld [vmem:[%s2744_s1 + $0x220] sm:$0xf]  ;;  %v1416_v54 = vor.u32 %v1716_v40, %v1415_v37 }
  0x29   :  { %939 = vmatpush.bf16.msrb.mxu1 %v1504_v53  ;;  %v1748_v48 = vld [vmem:[%s2744_s1 + $0x334] sm:$0xf0]  ;;  %v1607_v49 = vld [vmem:[%s2744_s1 + $0x3b0] sm:$0xf]  ;;  %v2160_v50 = vpack.c.bf16 %v81_v45, %v73_v44  ;;  %v1714_v53 = vld [vmem:[%s2744_s1 + $0x224] sm:$0xf0]  ;;  %v1480_v58 = vor.u32 %v1732_v42, %v1479_v41 }
  0x2a   :  { %953 = vmatpush.bf16.msrb.mxu2 %v1568_v1  ;;  %v1764_v51 = vld [vmem:[%s2744_s1 + $0x3b4] sm:$0xf0]  ;;  %890 = vmatmul.bf16.vlgmr.msra.gmra.mxu1 %v2147_v43  ;;  %v1730_v56 = vld [vmem:[%s2744_s1 + $0x2a4] sm:$0xf0]  ;;  %v1535_v57 = vld [vmem:[%s2744_s1 + $0x320] sm:$0xf]  ;;  %v1544_v59 = vor.u32 %v1748_v48, %v1543_v47  ;;  %v1408_v9 = vor.u32 %v1714_v53, %v1407_v52 }
  0x2b   :  { %967 = vmatpush.bf16.msrb.mxu3 %v1632_v2  ;;  %v1746_v60 = vld [vmem:[%s2744_s1 + $0x324] sm:$0xf0]  ;;  %v1599_v61 = vld [vmem:[%s2744_s1 + $0x3a0] sm:$0xf]  ;;  %v1608_v63 = vor.u32 %v1764_v51, %v1607_v49  ;;  %v1399_v0 = vld [vmem:[%s2744_s1 + $0x210] sm:$0xf]  ;;  %v1472_v13 = vor.u32 %v1730_v56, %v1471_v55 }
  0x2c   :  { %926 = vmatpush.bf16.msrb.mxu0 %v1432_v16  ;;  %918 = vmatmul.bf16.vlgmr.msra.gmra.mxu3 %v2160_v50  ;;  %v1762_v62 = vld [vmem:[%s2744_s1 + $0x3a4] sm:$0xf0]  ;;  %v1712_v1 = vld [vmem:[%s2744_s1 + $0x214] sm:$0xf0]  ;;  %v2200_v2 = vld [vmem:[%s2744_s1 + $0x290] sm:$0xf]  ;;  %v1536_v15 = vor.u32 %v1746_v60, %v1535_v57 }
  0x2d   :  { %940 = vmatpush.bf16.msrb.mxu1 %v1496_v17  ;;  %v2205_v3 = vld [vmem:[%s2744_s1 + $0x294] sm:$0xf0]  ;;  %v2210_v4 = vld [vmem:[%s2744_s1 + $0x310] sm:$0xf]  ;;  %v2230_v8 = vld [vmem:[%s2745_s0 + $0x20] sm:$0xff]  ;;  %v1600_v19 = vor.u32 %v1762_v62, %v1599_v61  ;;  %vm1126_vm4 = vcmask 7168  }
  0x2e   :  { %954 = vmatpush.bf16.msrb.mxu2 %v1560_v22  ;;  %v2215_v5 = vld [vmem:[%s2744_s1 + $0x314] sm:$0xf0]  ;;  %v2220_v6 = vld [vmem:[%s2744_s1 + $0x390] sm:$0xf]  ;;  %v2235_v10 = vld [vmem:[%s2744_s1 + $0x200] sm:$0xf]  ;;  %v1464_v24 = vor.u32 %v2205_v3, %v2200_v2 }
  0x2f   :  { %968 = vmatpush.bf16.msrb.mxu3 %v1624_v23  ;;  %v2225_v7 = vld [vmem:[%s2744_s1 + $0x394] sm:$0xf0]  ;;  %v2240_v11 = vld [vmem:[%s2744_s1 + $0x204] sm:$0xf0]  ;;  %v2245_v12 = vld [vmem:[%s2744_s1 + $0x280] sm:$0xf]  ;;  %v1400_v23 = vor.u32 %v1712_v1, %v1399_v0  ;;  %v1528_v25 = vor.u32 %v2215_v5, %v2210_v4 }
  0x30   :  { %927 = vmatpush.bf16.msrb.mxu0 %v1424_v32  ;;  %v2250_v16 = vld [vmem:[%s2744_s1 + $0x284] sm:$0xf0]  ;;  %v2255_v17 = vld [vmem:[%s2744_s1 + $0x300] sm:$0xf]  ;;  %v1592_v27 = vor.u32 %v2225_v7, %v2220_v6  ;;  %v28_v28 = vld [vmem:[%s2745_s0 + $0x30] sm:$0xff]  ;;  %v1392_v29 = vor.u32 %v2240_v11, %v2235_v10  ;;  %vm42_vm8 = vcmp.ge.f32.partialorder %v2230_v8, 0.0 }
  0x31   :  { %941 = vmatpush.bf16.msrb.mxu1 %v1488_v35  ;;  %v2260_v18 = vld [vmem:[%s2744_s1 + $0x304] sm:$0xf0]  ;;  %v2265_v20 = vld [vmem:[%s2744_s1 + $0x380] sm:$0xf]  ;;  %v1456_v30 = vor.u32 %v2250_v16, %v2245_v12  ;;  %v2291_v31 = vld [vmem:[%s2744_s1 + $0x74] sm:$0xf] }
  0x32   :  { %955 = vmatpush.bf16.msrb.mxu2 %v1552_v36  ;;  %v2270_v21 = vld [vmem:[%s2744_s1 + $0x384] sm:$0xf0]  ;;  %v34_v22 = vld [vmem:[%s2745_s0 + $0x60] sm:$0xff]  ;;  %v2296_v32 = vld [vmem:[%s2744_s1 + $0x78] sm:$0xf0]  ;;  %v1520_v36 = vor.u32 %v2260_v18, %v2255_v17  ;;  %vm44_vm10 = vcmp.ge.f32.partialorder %v28_v28, 0.0 }
  0x33   :  { %969 = vmatpush.bf16.msrb.mxu3 %v1616_v46  ;;  %vm50_vm9 = vcmp.ge.f32.partialorder %v34_v22, 0.0  ;;  %v36_v33 = vld [vmem:[%s2745_s0 + $0x70] sm:$0xff]  ;;  %v27_v34 = vld [vmem:[%s2745_s0 + $0x28] sm:$0xff]  ;;  %v1584_v37 = vor.u32 %v2270_v21, %v2265_v20  ;;  %v58_v38 = vmul.f32 0.05, %v2230_v8  ;;  %v29_v40 = vld [vmem:[%s2745_s0 + $0x38] sm:$0xff] }
  0x34   :  { %928 = vmatpush.bf16.msrb.mxu0 %v1416_v54  ;;  %v35_v35 = vld [vmem:[%s2745_s0 + $0x68] sm:$0xff]  ;;  %v66_v39 = vmul.f32 0.05, %v34_v22  ;;  %v37_v41 = vld [vmem:[%s2745_s0 + $0x78] sm:$0xff]  ;;  %v1675_v42 = vld [vmem:[%s2744_s1 + $0xf4] sm:$0xf]  ;;  %v1196_v54 = vor.u32 %v2291_v31, %v2296_v32 }
  0x35   :  { %942 = vmatpush.bf16.msrb.mxu1 %v1480_v58  ;;  %v1257_v44 = vld [vmem:[%s2744_s1 + $0xf8] sm:$0xf0]  ;;  %v1691_v45 = vld [vmem:[%s2744_s1 + $0x174] sm:$0xf]  ;;  %vm52_vm11 = vcmp.ge.f32.partialorder %v36_v33, 0.0  ;;  %vm43_vm12 = vcmp.ge.f32.partialorder %v27_v34, 0.0  ;;  %v74_v57 = vsel %vm42_vm8, %v2230_v8, %v58_v38 }
  0x36   :  { %956 = vmatpush.bf16.msrb.mxu2 %v1544_v59  ;;  %v1321_v46 = vld [vmem:[%s2744_s1 + $0x178] sm:$0xf0]  ;;  %v60_v47 = vmul.f32 0.05, %v28_v28  ;;  %v68_v48 = vmul.f32 0.05, %v36_v33  ;;  %v82_v58 = vsel %vm50_vm9, %v34_v22, %v66_v39 }
  0x37   :  { %970 = vmatpush.bf16.msrb.mxu3 %v1608_v63  ;;  %vm51_vm13 = vcmp.ge.f32.partialorder %v35_v35, 0.0  ;;  %v59_v49 = vmul.f32 0.05, %v27_v34  ;;  %v67_v51 = vmul.f32 0.05, %v35_v35  ;;  %vm45_vm14 = vcmp.ge.f32.partialorder %v29_v40, 0.0 }
  0x38   :  { %929 = vmatpush.bf16.msrb.mxu0 %v1408_v9  ;;  %vm53_vm15 = vcmp.ge.f32.partialorder %v37_v41, 0.0  ;;  %v61_v52 = vmul.f32 0.05, %v29_v40  ;;  %v69_v53 = vmul.f32 0.05, %v37_v41  ;;  %v76_v59 = vsel %vm44_vm10, %v28_v28, %v60_v47 }
  0x39   :  { %943 = vmatpush.bf16.msrb.mxu1 %v1472_v13  ;;  %v1707_v55 = vld [vmem:[%s2744_s1 + $0x1f4] sm:$0xf]  ;;  %v1385_v56 = vld [vmem:[%s2744_s1 + $0x1f8] sm:$0xf0]  ;;  %v84_v60 = vsel %vm52_vm11, %v36_v33, %v68_v48  ;;  %v75_v61 = vsel %vm43_vm12, %v27_v34, %v59_v49  ;;  %v83_v62 = vsel %vm51_vm13, %v35_v35, %v67_v51  ;;  %v1260_v63 = vor.u32 %v1675_v42, %v1257_v44  ;;  %v1657_v3 = vld [vmem:[%s2744_s1 + $0x64] sm:$0xf] }
  0x3a   :  { %957 = vmatpush.bf16.msrb.mxu2 %v1536_v15  ;;  %v1324_v0 = vor.u32 %v1691_v45, %v1321_v46  ;;  %v77_v1 = vsel %vm45_vm14, %v29_v40, %v61_v52  ;;  %v85_v2 = vsel %vm53_vm15, %v37_v41, %v69_v53  ;;  %v1185_v4 = vld [vmem:[%s2744_s1 + $0x68] sm:$0xf0]  ;;  %v1673_v5 = vld [vmem:[%s2744_s1 + $0xe4] sm:$0xf]  ;;  %v1388_v6 = vor.u32 %v1707_v55, %v1385_v56  ;;  %v1655_v20 = vld [vmem:[%s2744_s1 + $0x54] sm:$0xf] }
  0x3b   :  { %971 = vmatpush.bf16.msrb.mxu3 %v1600_v19  ;;  %v2358_v7 = vpack.c.bf16 %v82_v58, %v74_v57  ;;  %v1249_v8 = vld [vmem:[%s2744_s1 + $0xe8] sm:$0xf0]  ;;  %v1689_v9 = vld [vmem:[%s2744_s1 + $0x164] sm:$0xf]  ;;  %v2369_v11 = vpack.c.bf16 %v84_v60, %v76_v59  ;;  %v2371_v12 = vpack.c.bf16 %v83_v62, %v75_v61  ;;  %v2379_v16 = vpack.c.bf16 %v85_v2, %v77_v1  ;;  %v1177_v21 = vld [vmem:[%s2744_s1 + $0x58] sm:$0xf0] }
  0x3c   :  { %930 = vmatpush.bf16.msrb.mxu0 %v1400_v23  ;;  %v1313_v10 = vld [vmem:[%s2744_s1 + $0x168] sm:$0xf0]  ;;  %v1705_v13 = vld [vmem:[%s2744_s1 + $0x1e4] sm:$0xf]  ;;  %v1188_v17 = vor.u32 %v1657_v3, %v1185_v4  ;;  %v1252_v18 = vor.u32 %v1673_v5, %v1249_v8  ;;  %v1671_v22 = vld [vmem:[%s2744_s1 + $0xd4] sm:$0xf] }
  0x3d   :  { %944 = vmatpush.bf16.msrb.mxu1 %v1464_v24  ;;  %v1377_v15 = vld [vmem:[%s2744_s1 + $0x1e8] sm:$0xf0]  ;;  %v1316_v19 = vor.u32 %v1689_v9, %v1313_v10  ;;  %v1241_v24 = vld [vmem:[%s2744_s1 + $0xd8] sm:$0xf0]  ;;  %v1703_v28 = vld [vmem:[%s2744_s1 + $0x1d4] sm:$0xf] }
  0x3e   :  { %958 = vmatpush.bf16.msrb.mxu2 %v1528_v25  ;;  %v1380_v23 = vor.u32 %v1705_v13, %v1377_v15  ;;  %v1687_v25 = vld [vmem:[%s2744_s1 + $0x154] sm:$0xf]  ;;  %v1244_v31 = vor.u32 %v1671_v22, %v1241_v24  ;;  %v1653_v33 = vld [vmem:[%s2744_s1 + $0x44] sm:$0xf]  ;;  %v1169_v34 = vld [vmem:[%s2744_s1 + $0x48] sm:$0xf0] }
  0x3f   :  { %972 = vmatpush.bf16.msrb.mxu3 %v1592_v27  ;;  %v1305_v27 = vld [vmem:[%s2744_s1 + $0x158] sm:$0xf0]  ;;  %v1669_v35 = vld [vmem:[%s2744_s1 + $0xc4] sm:$0xf]  ;;  %v1297_v39 = vld [vmem:[%s2744_s1 + $0x148] sm:$0xf0]  ;;  %v1172_v42 = vor.u32 %v1653_v33, %v1169_v34 }
  0x40   :  { %931 = vmatpush.bf16.msrb.mxu0 %v1392_v29  ;;  %v1369_v29 = vld [vmem:[%s2744_s1 + $0x1d8] sm:$0xf0]  ;;  %v1308_v32 = vor.u32 %v1687_v25, %v1305_v27  ;;  %v1685_v38 = vld [vmem:[%s2744_s1 + $0x144] sm:$0xf]  ;;  %v1361_v41 = vld [vmem:[%s2744_s1 + $0x1c8] sm:$0xf0] }
  0x41   :  { %945 = vmatpush.bf16.msrb.mxu1 %v1456_v30  ;;  %v1180_v30 = vor.u32 %v1655_v20, %v1177_v21  ;;  %v1701_v40 = vld [vmem:[%s2744_s1 + $0x1c4] sm:$0xf]  ;;  %v1300_v45 = vor.u32 %v1685_v38, %v1297_v39  ;;  %v1651_v46 = vld [vmem:[%s2744_s1 + $0x34] sm:$0xf]  ;;  %v1161_v47 = vld [vmem:[%s2744_s1 + $0x38] sm:$0xf0] }
  0x42   :  { %959 = vmatpush.bf16.msrb.mxu2 %v1520_v36  ;;  %v1372_v36 = vor.u32 %v1703_v28, %v1369_v29  ;;  %v1667_v48 = vld [vmem:[%s2744_s1 + $0xb4] sm:$0xf]  ;;  %v1364_v49 = vor.u32 %v1701_v40, %v1361_v41  ;;  %v1225_v51 = vld [vmem:[%s2744_s1 + $0xb8] sm:$0xf0]  ;;  %v1164_v56 = vor.u32 %v1651_v46, %v1161_v47  ;;  %v1649_v59 = vld [vmem:[%s2744_s1 + $0x24] sm:$0xf] }
  0x43   :  { %973 = vmatpush.bf16.msrb.mxu3 %v1584_v37  ;;  %932 = vmatmul.bf16.vlgmr.msrb.gmra.mxu0 %v2358_v7  ;;  %v1233_v37 = vld [vmem:[%s2744_s1 + $0xc8] sm:$0xf0]  ;;  %v1683_v52 = vld [vmem:[%s2744_s1 + $0x134] sm:$0xf]  ;;  %v1289_v53 = vld [vmem:[%s2744_s1 + $0x138] sm:$0xf0]  ;;  %v1228_v57 = vor.u32 %v1667_v48, %v1225_v51 }
  0x44   :  { %980 = vmatpush.bf16.msra.mxu0 %v1196_v54  ;;  %946 = vmatmul.bf16.vlgmr.msrb.gmra.mxu1 %v2371_v12  ;;  %v1236_v44 = vor.u32 %v1669_v35, %v1233_v37  ;;  %v1699_v54 = vld [vmem:[%s2744_s1 + $0x1b4] sm:$0xf]  ;;  %v1353_v55 = vld [vmem:[%s2744_s1 + $0x1b8] sm:$0xf0]  ;;  %v1292_v58 = vor.u32 %v1683_v52, %v1289_v53  ;;  %v1153_v60 = vld [vmem:[%s2744_s1 + $0x28] sm:$0xf0] }
  0x45   :  { %994 = vmatpush.bf16.msra.mxu1 %v1260_v63  ;;  %960 = vmatmul.bf16.vlgmr.msrb.gmra.mxu2 %v2369_v11  ;;  %v1665_v61 = vld [vmem:[%s2744_s1 + $0xa4] sm:$0xf]  ;;  %v1356_v62 = vor.u32 %v1699_v54, %v1353_v55  ;;  %v1217_v63 = vld [vmem:[%s2744_s1 + $0xa8] sm:$0xf0]  ;;  %v1156_v4 = vor.u32 %v1649_v59, %v1153_v60  ;;  %v1647_v8 = vld [vmem:[%s2744_s1 + $0x14] sm:$0xf] }
  0x46   :  { %1008 = vmatpush.bf16.msra.mxu2 %v1324_v0  ;;  %974 = vmatmul.bf16.vlgmr.msrb.gmra.mxu3 %v2379_v16  ;;  %v1681_v0 = vld [vmem:[%s2744_s1 + $0x124] sm:$0xf]  ;;  %v1281_v1 = vld [vmem:[%s2744_s1 + $0x128] sm:$0xf0]  ;;  %v1220_v5 = vor.u32 %v1665_v61, %v1217_v63  ;;  %v1145_v9 = vld [vmem:[%s2744_s1 + $0x18] sm:$0xf0] }
  0x47   :  { %1022 = vmatpush.bf16.msra.mxu3 %v1388_v6  ;;  %v1697_v2 = vld [vmem:[%s2744_s1 + $0x1a4] sm:$0xf]  ;;  %v1345_v3 = vld [vmem:[%s2744_s1 + $0x1a8] sm:$0xf0]  ;;  %v1284_v6 = vor.u32 %v1681_v0, %v1281_v1  ;;  %v1663_v10 = vld [vmem:[%s2744_s1 + $0x94] sm:$0xf]  ;;  %v1148_v21 = vor.u32 %v1647_v8, %v1145_v9 }
  0x48   :  { %981 = vmatpush.bf16.msra.mxu0 %v1188_v17  ;;  %v1348_v13 = vor.u32 %v1697_v2, %v1345_v3  ;;  %v1209_v15 = vld [vmem:[%s2744_s1 + $0x98] sm:$0xf0]  ;;  %v1679_v17 = vld [vmem:[%s2744_s1 + $0x114] sm:$0xf]  ;;  %v1645_v22 = vld [vmem:[%s2744_s1 + $0x4] sm:$0xf] }
  0x49   :  { %995 = vmatpush.bf16.msra.mxu1 %v1252_v18  ;;  %v1273_v18 = vld [vmem:[%s2744_s1 + $0x118] sm:$0xf0]  ;;  %v1212_v24 = vor.u32 %v1663_v10, %v1209_v15  ;;  %v1661_v27 = vld [vmem:[%s2744_s1 + $0x84] sm:$0xf]  ;;  %v1201_v28 = vld [vmem:[%s2744_s1 + $0x88] sm:$0xf0] }
  0x4a   :  { %1009 = vmatpush.bf16.msra.mxu2 %v1316_v19  ;;  %v1695_v19 = vld [vmem:[%s2744_s1 + $0x194] sm:$0xf]  ;;  %v1337_v20 = vld [vmem:[%s2744_s1 + $0x198] sm:$0xf0]  ;;  %v1276_v25 = vor.u32 %v1679_v17, %v1273_v18  ;;  %v1677_v29 = vld [vmem:[%s2744_s1 + $0x104] sm:$0xf]  ;;  %v1204_v41 = vor.u32 %v1661_v27, %v1201_v28 }
  0x4b   :  { %1023 = vmatpush.bf16.msra.mxu3 %v1380_v23  ;;  %v1137_v23 = vld [vmem:[%s2744_s1 + $0x8] sm:$0xf0]  ;;  %v1723_v34 = vld [vmem:[%s2744_s1 + $0x274] sm:$0xf]  ;;  %v1449_v35 = vld [vmem:[%s2744_s1 + $0x278] sm:$0xf0] }
  0x4c   :  { %982 = vmatpush.bf16.msra.mxu0 %v1180_v30  ;;  %v1340_v30 = vor.u32 %v1695_v19, %v1337_v20  ;;  %v1329_v33 = vld [vmem:[%s2744_s1 + $0x188] sm:$0xf0]  ;;  %v1140_v37 = vor.u32 %v1645_v22, %v1137_v23  ;;  %v1513_v38 = vld [vmem:[%s2744_s1 + $0x2f8] sm:$0xf0]  ;;  %v1755_v39 = vld [vmem:[%s2744_s1 + $0x374] sm:$0xf]  ;;  %v1452_v47 = vor.u32 %v1723_v34, %v1449_v35 }
  0x4d   :  { %996 = vmatpush.bf16.msra.mxu1 %v1244_v31  ;;  %v1265_v31 = vld [vmem:[%s2744_s1 + $0x108] sm:$0xf0]  ;;  %v1577_v40 = vld [vmem:[%s2744_s1 + $0x378] sm:$0xf0]  ;;  %v1721_v51 = vld [vmem:[%s2744_s1 + $0x264] sm:$0xf] }
  0x4e   :  { %1010 = vmatpush.bf16.msra.mxu2 %v1308_v32  ;;  %v1693_v32 = vld [vmem:[%s2744_s1 + $0x184] sm:$0xf]  ;;  %v1441_v52 = vld [vmem:[%s2744_s1 + $0x268] sm:$0xf0]  ;;  %v1719_v63 = vld [vmem:[%s2744_s1 + $0x254] sm:$0xf] }
  0x4f   :  { %1024 = vmatpush.bf16.msra.mxu3 %v1372_v36  ;;  %v1739_v36 = vld [vmem:[%s2744_s1 + $0x2f4] sm:$0xf]  ;;  %v1332_v46 = vor.u32 %v1693_v32, %v1329_v33  ;;  %v1737_v53 = vld [vmem:[%s2744_s1 + $0x2e4] sm:$0xf]  ;;  %v1505_v55 = vld [vmem:[%s2744_s1 + $0x2e8] sm:$0xf0]  ;;  %v1444_v60 = vor.u32 %v1721_v51, %v1441_v52 }
  0x50   :  { %983 = vmatpush.bf16.msra.mxu0 %v1172_v42  ;;  %v1268_v42 = vor.u32 %v1677_v29, %v1265_v31  ;;  %v1516_v48 = vor.u32 %v1739_v36, %v1513_v38  ;;  %v1633_v59 = vld [vmem:[%s2744_s1 + $0x3e8] sm:$0xf0]  ;;  %v1508_v61 = vor.u32 %v1737_v53, %v1505_v55  ;;  %v1433_v0 = vld [vmem:[%s2744_s1 + $0x258] sm:$0xf0]  ;;  %v1735_v1 = vld [vmem:[%s2744_s1 + $0x2d4] sm:$0xf] }
  0x51   :  { %997 = vmatpush.bf16.msra.mxu1 %v1236_v44  ;;  %v1771_v44 = vld [vmem:[%s2744_s1 + $0x3f4] sm:$0xf]  ;;  %v1497_v3 = vld [vmem:[%s2744_s1 + $0x2d8] sm:$0xf0]  ;;  %v1436_v8 = vor.u32 %v1719_v63, %v1433_v0  ;;  %v1425_v15 = vld [vmem:[%s2744_s1 + $0x248] sm:$0xf0] }
  0x52   :  { %1011 = vmatpush.bf16.msra.mxu2 %v1300_v45  ;;  %v1641_v45 = vld [vmem:[%s2744_s1 + $0x3f8] sm:$0xf0]  ;;  %v1500_v9 = vor.u32 %v1735_v1, %v1497_v3  ;;  %v1749_v17 = vld [vmem:[%s2744_s1 + $0x344] sm:$0xf]  ;;  %v1553_v18 = vld [vmem:[%s2744_s1 + $0x348] sm:$0xf0] }
  0x53   :  { %1025 = vmatpush.bf16.msra.mxu3 %v1364_v49  ;;  %v1580_v49 = vor.u32 %v1755_v39, %v1577_v40  ;;  %v1644_v54 = vor.u32 %v1771_v44, %v1641_v45  ;;  %v1765_v19 = vld [vmem:[%s2744_s1 + $0x3c4] sm:$0xf]  ;;  %v1617_v20 = vld [vmem:[%s2744_s1 + $0x3c8] sm:$0xf0]  ;;  %v1556_v23 = vor.u32 %v1749_v17, %v1553_v18  ;;  %v1731_v27 = vld [vmem:[%s2744_s1 + $0x2b4] sm:$0xf] }
  0x54   :  { %984 = vmatpush.bf16.msra.mxu0 %v1164_v56  ;;  %v1753_v56 = vld [vmem:[%s2744_s1 + $0x364] sm:$0xf]  ;;  %v1620_v28 = vor.u32 %v1765_v19, %v1617_v20  ;;  %v1481_v29 = vld [vmem:[%s2744_s1 + $0x2b8] sm:$0xf0]  ;;  %v1763_v32 = vld [vmem:[%s2744_s1 + $0x3b4] sm:$0xf] }
  0x55   :  { %998 = vmatpush.bf16.msra.mxu1 %v1228_v57  ;;  %v1569_v57 = vld [vmem:[%s2744_s1 + $0x368] sm:$0xf0]  ;;  %v1545_v31 = vld [vmem:[%s2744_s1 + $0x338] sm:$0xf0]  ;;  %v1484_v35 = vor.u32 %v1731_v27, %v1481_v29  ;;  %v1729_v39 = vld [vmem:[%s2744_s1 + $0x2a4] sm:$0xf] }
  0x56   :  { %1012 = vmatpush.bf16.msra.mxu2 %v1292_v58  ;;  %v1769_v58 = vld [vmem:[%s2744_s1 + $0x3e4] sm:$0xf]  ;;  %v1609_v33 = vld [vmem:[%s2744_s1 + $0x3b8] sm:$0xf0]  ;;  %v1409_v38 = vld [vmem:[%s2744_s1 + $0x228] sm:$0xf0] }
  0x57   :  { %1026 = vmatpush.bf16.msra.mxu3 %v1356_v62  ;;  %v1572_v62 = vor.u32 %v1753_v56, %v1569_v57  ;;  %v1636_v2 = vor.u32 %v1769_v58, %v1633_v59  ;;  %v1612_v40 = vor.u32 %v1763_v32, %v1609_v33  ;;  %v1537_v44 = vld [vmem:[%s2744_s1 + $0x328] sm:$0xf0]  ;;  %v1761_v45 = vld [vmem:[%s2744_s1 + $0x3a4] sm:$0xf]  ;;  %v1711_v51 = vld [vmem:[%s2744_s1 + $0x214] sm:$0xf] }
  0x58   :  { %985 = vmatpush.bf16.msra.mxu0 %v1156_v4  ;;  %v1751_v4 = vld [vmem:[%s2744_s1 + $0x354] sm:$0xf]  ;;  %v1401_v52 = vld [vmem:[%s2744_s1 + $0x218] sm:$0xf0]  ;;  %v1709_v63 = vld [vmem:[%s2744_s1 + $0x204] sm:$0xf] }
  0x59   :  { %999 = vmatpush.bf16.msra.mxu1 %v1220_v5  ;;  %v1561_v5 = vld [vmem:[%s2744_s1 + $0x358] sm:$0xf0]  ;;  %v1727_v53 = vld [vmem:[%s2744_s1 + $0x294] sm:$0xf]  ;;  %v1393_v0 = vld [vmem:[%s2744_s1 + $0x208] sm:$0xf0] }
  0x5a   :  { %1013 = vmatpush.bf16.msra.mxu2 %v1284_v6  ;;  %v1767_v6 = vld [vmem:[%s2744_s1 + $0x3d4] sm:$0xf]  ;;  %v1564_v10 = vor.u32 %v1751_v4, %v1561_v5  ;;  %v1465_v55 = vld [vmem:[%s2744_s1 + $0x298] sm:$0xf0]  ;;  %v1725_v1 = vld [vmem:[%s2744_s1 + $0x284] sm:$0xf] }
  0x5b   :  { %1027 = vmatpush.bf16.msra.mxu3 %v1348_v13  ;;  %v1717_v13 = vld [vmem:[%s2744_s1 + $0x244] sm:$0xf]  ;;  %v1743_v56 = vld [vmem:[%s2744_s1 + $0x314] sm:$0xf]  ;;  %v1529_v57 = vld [vmem:[%s2744_s1 + $0x318] sm:$0xf0] }
  0x5c   :  { %986 = vmatpush.bf16.msra.mxu0 %v1148_v21  ;;  %v1428_v21 = vor.u32 %v1717_v13, %v1425_v15  ;;  %v1759_v58 = vld [vmem:[%s2744_s1 + $0x394] sm:$0xf]  ;;  %v1593_v59 = vld [vmem:[%s2744_s1 + $0x398] sm:$0xf0]  ;;  %v1457_v3 = vld [vmem:[%s2744_s1 + $0x288] sm:$0xf0] }
  0x5d   :  { %1000 = vmatpush.bf16.msra.mxu1 %v1212_v24  ;;  %v1715_v24 = vld [vmem:[%s2744_s1 + $0x234] sm:$0xf]  ;;  %v1741_v4 = vld [vmem:[%s2744_s1 + $0x304] sm:$0xf]  ;;  %v1521_v5 = vld [vmem:[%s2744_s1 + $0x308] sm:$0xf0] }
  0x5e   :  { %1014 = vmatpush.bf16.msra.mxu2 %v1276_v25  ;;  %v1417_v25 = vld [vmem:[%s2744_s1 + $0x238] sm:$0xf0] }
  0x5f   :  { %1028 = vmatpush.bf16.msra.mxu3 %v1340_v30  ;;  %v1747_v30 = vld [vmem:[%s2744_s1 + $0x334] sm:$0xf]  ;;  %v1420_v34 = vor.u32 %v1715_v24, %v1417_v25 }
  0x60   :  { %987 = vmatpush.bf16.msra.mxu0 %v1140_v37  ;;  %v1548_v36 = vor.u32 %v1747_v30, %v1545_v31  ;;  %v1713_v37 = vld [vmem:[%s2744_s1 + $0x224] sm:$0xf] }
  0x61   :  { %1001 = vmatpush.bf16.msra.mxu1 %v1204_v41  ;;  %v1473_v41 = vld [vmem:[%s2744_s1 + $0x2a8] sm:$0xf0] }
  0x62   :  { %1015 = vmatpush.bf16.msra.mxu2 %v1268_v42  ;;  %v1745_v42 = vld [vmem:[%s2744_s1 + $0x324] sm:$0xf] }
  0x63   :  { %1029 = vmatpush.bf16.msra.mxu3 %v1332_v46  ;;  %988 = vmatmul.bf16.vlgmr.msra.gmra.mxu0 %v2100_v14  ;;  %v1733_v14 = vld [vmem:[%s2744_s1 + $0x2c4] sm:$0xf]  ;;  %v1601_v46 = vld [vmem:[%s2744_s1 + $0x3a8] sm:$0xf0] }
  0x64   :  { %1036 = vmatpush.bf16.msrb.mxu0 %v1452_v47  ;;  %1002 = vmatmul.bf16.vlgmr.msra.gmra.mxu1 %v2147_v43  ;;  %v1489_v43 = vld [vmem:[%s2744_s1 + $0x2c8] sm:$0xf0]  ;;  %v1412_v47 = vor.u32 %v1713_v37, %v1409_v38 }
  0x65   :  { %1050 = vmatpush.bf16.msrb.mxu1 %v1516_v48  ;;  %1016 = vmatmul.bf16.vlgmr.msra.gmra.mxu2 %v2121_v26  ;;  %v1625_v26 = vld [vmem:[%s2744_s1 + $0x3d8] sm:$0xf0]  ;;  %v1492_v22 = vor.u32 %v1733_v14, %v1489_v43  ;;  %v1476_v48 = vor.u32 %v1729_v39, %v1473_v41 }
  0x66   :  { %1064 = vmatpush.bf16.msrb.mxu2 %v1580_v49  ;;  %1030 = vmatmul.bf16.vlgmr.msra.gmra.mxu3 %v2160_v50  ;;  %v1628_v50 = vor.u32 %v1767_v6, %v1625_v26  ;;  %v1540_v49 = vor.u32 %v1745_v42, %v1537_v44  ;;  %v1757_v6 = vld [vmem:[%s2744_s1 + $0x384] sm:$0xf]  ;;  %v1585_v26 = vld [vmem:[%s2744_s1 + $0x388] sm:$0xf0] }
  0x67   :  { %1078 = vmatpush.bf16.msrb.mxu3 %v1644_v54  ;;  %v1604_v54 = vor.u32 %v1761_v45, %v1601_v46  ;;  %v1588_v13 = vor.u32 %v1757_v6, %v1585_v26  ;;  %v10_v46 = vstv %s2747_s4 }
  0x68   :  { %1037 = vmatpush.bf16.msrb.mxu0 %v1444_v60  ;;  %v1404_v60 = vor.u32 %v1711_v51, %v1401_v52  ;;  %11 = vst [vmem:[#allocation2] sm:$0x1] %v10_v46 }
  0x69   :  { %1051 = vmatpush.bf16.msrb.mxu1 %v1508_v61  ;;  %v1468_v61 = vor.u32 %v1727_v53, %v1465_v55 }
  0x6a   :  { %1065 = vmatpush.bf16.msrb.mxu2 %v1572_v62  ;;  %v1532_v62 = vor.u32 %v1743_v56, %v1529_v57 }
  0x6b   :  { %1079 = vmatpush.bf16.msrb.mxu3 %v1636_v2  ;;  %v1596_v2 = vor.u32 %v1759_v58, %v1593_v59 }
  0x6c   :  { %1038 = vmatpush.bf16.msrb.mxu0 %v1436_v8  ;;  %v1396_v8 = vor.u32 %v1709_v63, %v1393_v0 }
  0x6d   :  { %1052 = vmatpush.bf16.msrb.mxu1 %v1500_v9  ;;  %v1460_v9 = vor.u32 %v1725_v1, %v1457_v3 }
  0x6e   :  { %1066 = vmatpush.bf16.msrb.mxu2 %v1564_v10  ;;  %v1524_v10 = vor.u32 %v1741_v4, %v1521_v5 }
  0x6f   :  { %1080 = vmatpush.bf16.msrb.mxu3 %v1628_v50 }
  0x70   :  { %1039 = vmatpush.bf16.msrb.mxu0 %v1428_v21 }
  0x71   :  { %1053 = vmatpush.bf16.msrb.mxu1 %v1492_v22 }
  0x72   :  { %1067 = vmatpush.bf16.msrb.mxu2 %v1556_v23 }
  0x73   :  { %1081 = vmatpush.bf16.msrb.mxu3 %v1620_v28 }
  0x74   :  { %1040 = vmatpush.bf16.msrb.mxu0 %v1420_v34 }
  0x75   :  { %1054 = vmatpush.bf16.msrb.mxu1 %v1484_v35 }
  0x76   :  { %1068 = vmatpush.bf16.msrb.mxu2 %v1548_v36 }
  0x77   :  { %1082 = vmatpush.bf16.msrb.mxu3 %v1612_v40 }
  0x78   :  { %1041 = vmatpush.bf16.msrb.mxu0 %v1412_v47 }
  0x79   :  { %1055 = vmatpush.bf16.msrb.mxu1 %v1476_v48 }
  0x7a   :  { %1069 = vmatpush.bf16.msrb.mxu2 %v1540_v49 }
  0x7b   :  { %1083 = vmatpush.bf16.msrb.mxu3 %v1604_v54 }
  0x7c   :  { %1042 = vmatpush.bf16.msrb.mxu0 %v1404_v60 }
  0x7d   :  { %1056 = vmatpush.bf16.msrb.mxu1 %v1468_v61 }
  0x7e   :  { %1070 = vmatpush.bf16.msrb.mxu2 %v1532_v62 }
  0x7f   :  { %1084 = vmatpush.bf16.msrb.mxu3 %v1596_v2 }
  0x80   :  { %1043 = vmatpush.bf16.msrb.mxu0 %v1396_v8  ;;  %v1104_v8 = vld [vmem:[%s2748_s3] sm:$0x3] }
  0x81   :  { %1057 = vmatpush.bf16.msrb.mxu1 %v1460_v9 }
  0x82   :  { %1071 = vmatpush.bf16.msrb.mxu2 %v1524_v10 }
  0x83   :  { %1085 = vmatpush.bf16.msrb.mxu3 %v1588_v13  ;;  %1044 = vmatmul.bf16.vlgmr.msrb.gmra.mxu0 %v2358_v7  ;;  %v222_v7 = vld [vmem:[%s2746_s2] sm:$0x3]  ;;  %v1106_v13 = vperm.slane %v1104_v8, 0 }
  0x84   :  { %1058 = vmatmul.bf16.vlgmr.msrb.gmra.mxu1 %v2371_v12  ;;  %v224_v12 = vperm.slane %v222_v7, 0  ;;  %v225_v32 = vperm.slane %v222_v7, 1 }
  0x85   :  { %1072 = vmatmul.bf16.vlgmr.msrb.gmra.mxu2 %v2369_v11 }
  0x86   :  { %1086 = vmatmul.bf16.vlgmr.msrb.gmra.mxu3 %v2379_v16 }
  0xa2   :  { %v877_v15 = vpop.f32.mrf.mxu0 }
  0xa3   :  { %v878_v25 = vadd.f32 %v877_v15, %v224_v12  ;;  %v1107_v15 = vperm.slane %v1104_v8, 1 }
  0xa7   :  { %v891_v14 = vpop.f32.mrf.mxu1 }
  0xa8   :  { %v892_v27 = vadd.f32 %v891_v14, %v878_v25 }
  0xaa   :  { %v905_v50 = vpop.f32.mrf.mxu2  ;;  %v879_v17 = vpop.f32.mrf.mxu0 }
  0xab   :  { %v906_v31 = vadd.f32 %v905_v50, %v892_v27  ;;  %v880_v34 = vadd.f32 %v879_v17, %v224_v12 }
  0xaf   :  { %v919_v43 = vpop.f32.mrf.mxu3  ;;  %v893_v18 = vpop.f32.mrf.mxu1 }
  0xb0   :  { %v920_v35 = vadd.f32 %v919_v43, %v906_v31  ;;  %v894_v38 = vadd.f32 %v893_v18, %v880_v34  ;;  %v1773_v31 = vld [vmem:[#allocation2] ss:$0 sm:$0xff] }
  0xb2   :  { %v907_v19 = vpop.f32.mrf.mxu2 }
  0xb3   :  { %v908_v44 = vadd.f32 %v907_v19, %v894_v38 }
  0xb7   :  { %v921_v20 = vpop.f32.mrf.mxu3 }
  0xb8   :  { %v922_v51 = vadd.f32 %v921_v20, %v908_v44 }
  0xc0   :  { %v933_v21 = vpop.f32.mrf.mxu0 }
  0xc1   :  { %v947_v22 = vpop.f32.mrf.mxu1  ;;  %v934_v40 = vadd.f32 %v933_v21, %v920_v35 }
  0xc3   :  { %v948_v47 = vadd.f32 %v947_v22, %v934_v40 }
  0xc8   :  { %v961_v23 = vpop.f32.mrf.mxu2  ;;  %v935_v11 = vpop.f32.mrf.mxu0 }
  0xc9   :  { %v975_v24 = vpop.f32.mrf.mxu3  ;;  %v949_v16 = vpop.f32.mrf.mxu1  ;;  %v962_v53 = vadd.f32 %v961_v23, %v948_v47  ;;  %v936_v58 = vadd.f32 %v935_v11, %v922_v51 }
  0xcb   :  { %v976_v61 = vadd.f32 %v975_v24, %v962_v53  ;;  %v950_v63 = vadd.f32 %v949_v16, %v936_v58 }
  0xcd   :  { %v1096_v2 = vmul.f32 0.05, %v976_v61  ;;  %vm1092_vm0 = vcmp.ge.f32.partialorder %v976_v61, 0.0 }
  0xcf   :  { %v1100_v43 = vsel %vm1092_vm0, %v976_v61, %v1096_v2 }
  0xd0   :  { %v963_v28 = vpop.f32.mrf.mxu2  ;;  %v1110_v21 = vmul.f32 %v1106_v13, %v1100_v43 }
  0xd1   :  { %v977_v29 = vpop.f32.mrf.mxu3  ;;  %v964_v3 = vadd.f32 %v963_v28, %v950_v63 }
  0xd3   :  { %v978_v14 = vadd.f32 %v977_v29, %v964_v3 }
  0xd5   :  { %v1098_v7 = vmul.f32 0.05, %v978_v14  ;;  %vm1094_vm2 = vcmp.ge.f32.partialorder %v978_v14, 0.0 }
  0xd7   :  { %v1102_v16 = vsel %vm1094_vm2, %v978_v14, %v1098_v7 }
  0xd8   :  { %v1112_v28 = vmul.f32 %v1106_v13, %v1102_v16 }
  0xe0   :  { %v989_v30 = vpop.f32.mrf.mxu0 }
  0xe1   :  { %v1003_v33 = vpop.f32.mrf.mxu1  ;;  %v990_v36 = vadd.f32 %v989_v30, %v225_v32 }
  0xe3   :  { %v1004_v41 = vadd.f32 %v1003_v33, %v990_v36 }
  0xe8   :  { %v1017_v37 = vpop.f32.mrf.mxu2  ;;  %v991_v42 = vpop.f32.mrf.mxu0 }
  0xe9   :  { %v1031_v39 = vpop.f32.mrf.mxu3  ;;  %v1005_v45 = vpop.f32.mrf.mxu1  ;;  %v1018_v48 = vadd.f32 %v1017_v37, %v1004_v41  ;;  %v992_v49 = vadd.f32 %v991_v42, %v225_v32 }
  0xeb   :  { %v1032_v54 = vadd.f32 %v1031_v39, %v1018_v48  ;;  %v1006_v55 = vadd.f32 %v1005_v45, %v992_v49 }
  0xf0   :  { %v1019_v52 = vpop.f32.mrf.mxu2 }
  0xf1   :  { %v1033_v56 = vpop.f32.mrf.mxu3  ;;  %v1020_v62 = vadd.f32 %v1019_v52, %v1006_v55 }
  0xf3   :  { %v1034_v4 = vadd.f32 %v1033_v56, %v1020_v62 }
 0x100   :  { %v1045_v57 = vpop.f32.mrf.mxu0 }
 0x101   :  { %v1046_v59 = vadd.f32 %v1045_v57, %v1032_v54  ;;  %v1059_v60 = vpop.f32.mrf.mxu1 }
 0x103   :  { %v1060_v0 = vadd.f32 %v1059_v60, %v1046_v59 }
 0x108   :  { %v1073_v1 = vpop.f32.mrf.mxu2  ;;  %v1047_v26 = vpop.f32.mrf.mxu0 }
 0x109   :  { %v1074_v5 = vadd.f32 %v1073_v1, %v1060_v0  ;;  %v1087_v6 = vpop.f32.mrf.mxu3  ;;  %v1048_v10 = vadd.f32 %v1047_v26, %v1034_v4  ;;  %v1061_v17 = vpop.f32.mrf.mxu1 }
 0x10b   :  { %v1088_v9 = vadd.f32 %v1087_v6, %v1074_v5  ;;  %v1062_v18 = vadd.f32 %v1061_v17, %v1048_v10 }
 0x10d   :  { %vm1093_vm1 = vcmp.ge.f32.partialorder %v1088_v9, 0.0  ;;  %v1097_v50 = vmul.f32 0.05, %v1088_v9 }
 0x10f   :  { %v1101_v19 = vsel %vm1093_vm1, %v1088_v9, %v1097_v50 }
 0x110   :  { %v1075_v20 = vpop.f32.mrf.mxu2  ;;  %v1111_v22 = vmul.f32 %v1107_v15, %v1101_v19 }
 0x111   :  { %v1076_v23 = vadd.f32 %v1075_v20, %v1062_v18  ;;  %v1089_v12 = vpop.f32.mrf.mxu3 }
 0x112   :  { %v1114_v24 = vadd.f32 %v1111_v22, %v1110_v21 }
 0x113   :  { %v1090_v11 = vadd.f32 %v1089_v12, %v1076_v23 }
 0x114   :  { %1115 = vadd.xlane.f32.xlu0 %v1114_v24 }
 0x115   :  { %vm1095_vm3 = vcmp.ge.f32.partialorder %v1090_v11, 0.0  ;;  %v1099_v25 = vmul.f32 0.05, %v1090_v11 }
 0x117   :  { %v1103_v27 = vsel %vm1095_vm3, %v1090_v11, %v1099_v25 }
 0x118   :  { %v1113_v29 = vmul.f32 %v1107_v15, %v1103_v27 }
 0x11a   :  { %v1117_v30 = vadd.f32 %v1113_v29, %v1112_v28 }
 0x11c   :  { %1118 = vadd.xlane.f32.xlu0 %v1117_v30 }
 0x187   :  { %v1116_v32 = vpop.xlane.xlu0 %1115 }
 0x188   :  { %v1124_v33 = vadd.f32 %v1773_v31, %v1116_v32 }
 0x18a   :  { %1127 = vst.msk [vmem:[%s2749_s5] sm:$0xff] %vm1126_vm4, %v1124_v33 }
 0x18f   :  { %v1119_v34 = vpop.xlane.xlu0 %1118 }
 0x190   :  { %v1125_v35 = vadd.f32 %v1773_v31, %v1119_v34 }
 0x192   :  { %1128 = vst.msk [vmem:[%s2749_s5 + $0x8] sm:$0xff] %vm1126_vm4, %v1125_v35 }

</bundles_post_ra>
